<compile_context>
chip_gen: v7x
topology: tpu7x:2x2x1
jax: 0.10.0
libtpu: 0.0.40
codegen_flags: <defaults>
</compile_context>

<pallas_src>
import jax
import jax.numpy as jnp
from jax.experimental import pallas as pl
from jax.experimental.pallas import tpu as pltpu

IN_FEATURES = 144
HIDDEN = 144
OUT_FEATURES = 1


def value_net_kernel(x_ref, w1_ref, b1_ref, w2_ref, b2_ref, o_ref):
    # x_ref:  [TB, 144]  (VMEM, batch tile)
    # w1_ref: [144, 144] (VMEM, resident across grid steps)
    # b1_ref: [1, 144]   (VMEM)
    # w2_ref: [1, 144]   (VMEM) -- second layer weight as a row vector
    # b2_ref: [1, 1]     (SMEM scalar)
    x = x_ref[...]
    # Layer 1 on the MXU, f32 accumulation.
    h = jnp.dot(x, w1_ref[...], preferred_element_type=jnp.float32)
    h = jnp.maximum(h + b1_ref[...], 0.0)                      # bias + ReLU (VPU)
    # Layer 2 (N=1): VPU multiply + XLU lane reduction instead of an MXU pass.
    y = jnp.sum(h * w2_ref[...], axis=-1, keepdims=True)       # [TB, 1]
    o_ref[...] = (y + b2_ref[0, 0]).astype(o_ref.dtype)        # scalar bias from SMEM


def _round_up(n, m):
    return ((n + m - 1) // m) * m


def value_network_forward(x, w1, b1, w2, b2, *, tb=2048):
    """x: [B, 144] f32 -> [B, 1] f32.

    w1: [144, 144] (in, out), b1: [1, 144], w2: [1, 144] (row vector), b2: [1, 1].
    """
    B = x.shape[0]
    # Batch tile:
    #  * multiple of 8 (sublane) so the BlockSpec is legal for any B,
    #  * capped at round_up(ceil(B/2), 8) so there are >= 2 grid tiles whenever
    #    B > 8 (lets the "parallel" axis use both v7x TensorCores).
    half = max(8, _round_up(pl.cdiv(B, 2), 8))
    tb = max(8, min(tb, half))
    num_tiles = pl.cdiv(B, tb)  # partial last tile is masked by Pallas; no jnp.pad

    cost = pl.CostEstimate(
        flops=2 * B * IN_FEATURES * HIDDEN + 2 * B * HIDDEN,
        transcendentals=0,
        bytes_accessed=(
            B * (IN_FEATURES + OUT_FEATURES) * 4     # x in, y out
            + IN_FEATURES * HIDDEN * 4                # W1
            + 2 * HIDDEN * 4 + 4                      # b1, w2 row, b2
        ),
    )

    out = pl.pallas_call(
        value_net_kernel,
        out_shape=jax.ShapeDtypeStruct((B, OUT_FEATURES), jnp.float32),
        grid=(num_tiles,),
        in_specs=[
            # x: tiled over the batch axis (pipelined / double-buffered).
            pl.BlockSpec((tb, IN_FEATURES), lambda i: (i, 0)),
            # Weights / b1 / w2: constant index_map -> loaded once, VMEM-resident.
            pl.BlockSpec((IN_FEATURES, HIDDEN), lambda i: (0, 0)),
            pl.BlockSpec((1, HIDDEN), lambda i: (0, 0)),
            pl.BlockSpec((1, HIDDEN), lambda i: (0, 0)),
            # b2: scalar in SMEM (no padded VMEM tile, no per-step DMA).
            pl.BlockSpec(memory_space=pltpu.MemorySpace.SMEM),
        ],
        out_specs=pl.BlockSpec((tb, OUT_FEATURES), lambda i: (i, 0)),
        compiler_params=pltpu.CompilerParams(
            dimension_semantics=("parallel",),
        ),
        cost_estimate=cost,
    )(x, w1, b1, w2, b2)

    return out


def init_params(key):
    """Deterministic init mimicking PyTorch Linear default (U[-1/sqrt(fan_in), +])."""
    k1, k2, k3, k4 = jax.random.split(key, 4)
    bound1 = 1.0 / jnp.sqrt(IN_FEATURES)
    bound2 = 1.0 / jnp.sqrt(HIDDEN)
    # W1 stored as [in, out]; W2 stored as a [1, HIDDEN] row vector.
    w1 = jax.random.uniform(k1, (IN_FEATURES, HIDDEN), jnp.float32, -bound1, bound1)
    b1 = jax.random.uniform(k2, (1, HIDDEN), jnp.float32, -bound1, bound1)
    w2 = jax.random.uniform(k3, (1, HIDDEN), jnp.float32, -bound2, bound2)
    b2 = jax.random.uniform(k4, (1, OUT_FEATURES), jnp.float32, -bound2, bound2)
    return w1, b1, w2, b2


def reference_forward(x, w1, b1, w2, b2):
    h = jnp.maximum(x @ w1 + b1, 0.0)
    return h @ w2.T + b2


if __name__ == "__main__":
    key = jax.random.PRNGKey(0)
    kx, kp = jax.random.split(key)

    w1, b1, w2, b2 = init_params(kp)

    # Small batch (single tile, B <= 8).
    B = 8
    x = jax.random.normal(kx, (B, IN_FEATURES), jnp.float32)
    out = jax.block_until_ready(value_network_forward(x, w1, b1, w2, b2))
    ref = reference_forward(x, w1, b1, w2, b2)
    assert out.shape == (B, OUT_FEATURES), out.shape
    assert jnp.allclose(out, ref, atol=1e-4, rtol=1e-4), (out, ref)

    # Batch that does not divide the tile size: exercises the masked partial
    # tile (no jnp.pad) and the >=2-tile split for the parallel batch axis.
    B2 = 1000
    x2 = jax.random.normal(kx, (B2, IN_FEATURES), jnp.float32)
    out2 = jax.block_until_ready(value_network_forward(x2, w1, b1, w2, b2))
    ref2 = reference_forward(x2, w1, b1, w2, b2)
    assert out2.shape == (B2, OUT_FEATURES), out2.shape
    assert jnp.allclose(out2, ref2, atol=1e-4, rtol=1e-4)

    print("KERNEL_OK")
</pallas_src>

<mosaic_0001>
module attributes {stable_mosaic.version = 11 : i64} {
  func.func @value_net_kernel(%arg0: i32, %arg1: memref<8x144xf32, #tpu.memory_space<vmem>>, %arg2: memref<144x144xf32, #tpu.memory_space<vmem>>, %arg3: memref<1x144xf32, #tpu.memory_space<vmem>>, %arg4: memref<1x144xf32, #tpu.memory_space<vmem>>, %arg5: memref<1x1xf32, #tpu.memory_space<smem>>, %arg6: memref<8x1xf32, #tpu.memory_space<vmem>>) attributes {dimension_semantics = [#tpu.dimension_semantics<parallel>], iteration_bounds = array<i64: 1>, scalar_prefetch = 0 : i64, scratch_operands = 0 : i64, tpu.core_type = #tpu.core_type<tc>, window_params = [{transform_indices = @transform_0, window_bounds = array<i64: 8, 144>}, {pipeline_mode = #tpu.pipeline_mode<synchronous>, transform_indices = @transform_1, window_bounds = array<i64: 144, 144>}, {pipeline_mode = #tpu.pipeline_mode<synchronous>, transform_indices = @transform_2, window_bounds = array<i64: 1, 144>}, {pipeline_mode = #tpu.pipeline_mode<synchronous>, transform_indices = @transform_3, window_bounds = array<i64: 1, 144>}, {transform_indices = @transform_4, window_bounds = array<i64: 1, 1>}, {transform_indices = @transform_5, window_bounds = array<i64: 8, 1>}]} {
    %c0 = arith.constant 0 : index
    %c0_0 = arith.constant 0 : index
    %0 = vector.load %arg1[%c0, %c0_0] : memref<8x144xf32, #tpu.memory_space<vmem>>, vector<8x144xf32>
    %c0_1 = arith.constant 0 : index
    %c0_2 = arith.constant 0 : index
    %1 = vector.load %arg2[%c0_1, %c0_2] : memref<144x144xf32, #tpu.memory_space<vmem>>, vector<144x144xf32>
    %cst = arith.constant dense<0.000000e+00> : vector<8x144xf32>
    %2 = tpu.matmul %0, %1, %cst {dimension_numbers = #tpu.dot_dimension_numbers<[1], [0], [0], [1], [0, 0, 1, 1], [], []>} : vector<8x144xf32>, vector<144x144xf32>, vector<8x144xf32> -> vector<8x144xf32>
    %c0_3 = arith.constant 0 : index
    %c0_4 = arith.constant 0 : index
    %3 = vector.load %arg3[%c0_3, %c0_4] : memref<1x144xf32, #tpu.memory_space<vmem>>, vector<1x144xf32>
    %4 = vector.broadcast %3 : vector<1x144xf32> to vector<8x144xf32>
    %5 = arith.addf %2, %4 : vector<8x144xf32>
    %cst_5 = arith.constant 0.000000e+00 : f32
    %6 = vector.broadcast %cst_5 : f32 to vector<8x144xf32>
    %7 = arith.maximumf %5, %6 : vector<8x144xf32>
    %c0_6 = arith.constant 0 : index
    %c0_7 = arith.constant 0 : index
    %8 = vector.load %arg4[%c0_6, %c0_7] : memref<1x144xf32, #tpu.memory_space<vmem>>, vector<1x144xf32>
    %9 = vector.broadcast %8 : vector<1x144xf32> to vector<8x144xf32>
    %10 = arith.mulf %7, %9 : vector<8x144xf32>
    %cst_8 = arith.constant dense<0.000000e+00> : vector<8xf32>
    %11 = vector.multi_reduction <add>, %10, %cst_8 [1] : vector<8x144xf32> to vector<8xf32>
    %12 = vector.shape_cast %11 : vector<8xf32> to vector<8x1xf32>
    %c0_9 = arith.constant 0 : index
    %c0_10 = arith.constant 0 : index
    %13 = memref.load %arg5[%c0_9, %c0_10] : memref<1x1xf32, #tpu.memory_space<smem>>
    %14 = vector.broadcast %13 : f32 to vector<8x1xf32>
    %15 = arith.addf %12, %14 : vector<8x1xf32>
    %c0_11 = arith.constant 0 : index
    %c0_12 = arith.constant 0 : index
    %16 = vector.load %arg6[%c0_11, %c0_12] : memref<8x1xf32, #tpu.memory_space<vmem>>, vector<8x1xf32>
    tpu.vector_store %arg6[%c0_11, %c0_12], %15 {strides = array<i32>} : memref<8x1xf32, #tpu.memory_space<vmem>>, vector<8x1xf32>,
    return
  }
  func.func @transform_0(%arg0: i32) -> (i32, i32) {
    %c0_i32 = arith.constant 0 : i32
    %c0_i32_0 = arith.constant 0 : i32
    return %arg0, %c0_i32 : i32, i32
  }
  func.func @transform_1(%arg0: i32) -> (i32, i32) {
    %c0_i32 = arith.constant 0 : i32
    %c0_i32_0 = arith.constant 0 : i32
    %c0_i32_1 = arith.constant 0 : i32
    return %c0_i32, %c0_i32_0 : i32, i32
  }
  func.func @transform_2(%arg0: i32) -> (i32, i32) {
    %c0_i32 = arith.constant 0 : i32
    %c0_i32_0 = arith.constant 0 : i32
    %c0_i32_1 = arith.constant 0 : i32
    return %c0_i32, %c0_i32_0 : i32, i32
  }
  func.func @transform_3(%arg0: i32) -> (i32, i32) {
    %c0_i32 = arith.constant 0 : i32
    %c0_i32_0 = arith.constant 0 : i32
    %c0_i32_1 = arith.constant 0 : i32
    return %c0_i32, %c0_i32_0 : i32, i32
  }
  func.func @transform_4(%arg0: i32) -> (i32, i32) {
    %c0_i32 = arith.constant 0 : i32
    %c0_i32_0 = arith.constant 0 : i32
    %c0_i32_1 = arith.constant 0 : i32
    return %c0_i32, %c0_i32_0 : i32, i32
  }
  func.func @transform_5(%arg0: i32) -> (i32, i32) {
    %c0_i32 = arith.constant 0 : i32
    %c0_i32_0 = arith.constant 0 : i32
    return %arg0, %c0_i32 : i32, i32
  }
}

</mosaic_0001>

<bundles_post_ra>
// kernel: tpu_custom_call.1
= control target key start
LH: loop header
LB: loop body
LE: loop exit
PB: predicated region body
PF: predicated region fallthrough
CT: control target
= control target key end

     0   :  { %11 = vsyncpa [#allocation4], 0  ;;  %s371_s0 = inlined_call_operand.hbm [shape: f32[8,144], index: 0, kind: input, shape index: {}]   ;;  %s372_s1 = inlined_call_operand.hbm [shape: f32[144,144], index: 1, kind: input, shape index: {}]   ;;  %s373_s2 = inlined_call_operand.vmem [shape: f32[1,144], index: 2, kind: input, shape index: {}]   ;;  %s374_s3 = inlined_call_operand.vmem [shape: f32[1,144], index: 3, kind: input, shape index: {}]   ;;  %s375_s4 = inlined_call_operand.<no memory space> [shape: f32[1,1], index: 4, kind: input, shape index: {}]   ;;  %s376_s5 = inlined_call_operand.vmem [shape: f32[8,1], index: 5, kind: output, shape index: {}]  }
   0x1   :  { %12 = vsyncpa [#allocation6], 0  ;;  %s292_s18 = smov [#allocation3]   ;;  %s293_s20 = smov [#allocation5]  }
   0x2   :  { %s19_s19 = sshll.u32 %s292_s18, 4  ;;  %s28_s21 = sshll.u32 %s293_s20, 4  ;;  %s20_s19 = int_to_ptr.vmem [resolvable:$true] %s19_s19  ;;  %s326_s21 = int_to_ptr.vmem [resolvable:$true] %s28_s21 }
   0x3   :  { %s244_s24 = scalar_lea.hbm %s371_s0, 256 }
   0x4   :  { %p245_p0 = scmp.ne.s32.totalorder %s371_s0, %s244_s24  ;;  %p248_p1 = scmp.lt.u32.totalorder %s244_s24, %s371_s0 }
   0x6   :  { %p250_p2 = pnand %p248_p1, %p245_p0 }
   0x8   :  { %253 = shalt.err (!%p250_p2)
}
   0x9   :  { %s254_s29 = scalar_lea.vmem %s20_s19, 256  ;;  %p259_p4 = scmp.lt.s32.totalorder %s20_s19, %s20_s19 }
   0xa   :  { %p255_p3 = scmp.ne.s32.totalorder %s20_s19, %s254_s29  ;;  %p260_p5 = scmp.lt.s32.totalorder %s254_s29, %s254_s29 }
   0xc   :  { %p261_p6 = por %p260_p5, %p259_p4 }
   0xe   :  { %p262_p7 = pnand %p261_p6, %p255_p3 }
  0x10   :  { %265 = shalt.err (!%p262_p7)
}
  0x11   :  { %22 = dma.hbm_to_vmem [thread:$0]  %s371_s0, 256, %s20_s19, [#allocation4]  }
  0x12   :  { %s266_s9 = scalar_lea.hbm %s372_s1, 4608 }
  0x13   :  { %p267_p8 = scmp.ne.s32.totalorder %s372_s1, %s266_s9  ;;  %p270_p9 = scmp.lt.u32.totalorder %s266_s9, %s372_s1 }
  0x15   :  { %p272_p10 = pnand %p270_p9, %p267_p8 }
  0x17   :  { %275 = shalt.err (!%p272_p10)
}
  0x18   :  { %s276_s14 = scalar_lea.vmem %s326_s21, 4608  ;;  %p281_p12 = scmp.lt.s32.totalorder %s326_s21, %s326_s21 }
  0x19   :  { %p277_p11 = scmp.ne.s32.totalorder %s326_s21, %s276_s14  ;;  %p282_p13 = scmp.lt.s32.totalorder %s276_s14, %s276_s14 }
  0x1b   :  { %p283_p0 = por %p282_p13, %p281_p12 }
  0x1d   :  { %p284_p1 = pnand %p283_p0, %p277_p11 }
  0x1f   :  { %287 = shalt.err (!%p284_p1)
}
  0x20   :  { %s294_s0 = smov 256   ;;  %s295_s15 = smov 16  }
  0x21   :  { %34 = dma.hbm_to_vmem [thread:$0]  %s372_s1, 4608, %s326_s21, [#allocation6], %s294_s0, %s294_s0, %s295_s15  }
  0x22   :  { %288 = dma.done.wait [#allocation4], 256  }
  0x23   :  { %289 = vsyncadd [#allocation4], 4294967040 }
  0x24   :  { %290 = dma.done.wait [#allocation6], 4608  }
  0x25   :  { %291 = vsyncadd [#allocation6], 4294962688  ;;  %v50_v0 = vld [vmem:[#allocation5 + $0x8] sm:$0xff]  ;;  %v52_v1 = vld [vmem:[#allocation5 + $0x18] sm:$0xff]  ;;  %vm97_vm0 = vcmask 130048   ;;  %v87_v56 = vlaneseq  ;;  %vm195_vm1 = vcmask 7168  }
  0x26   :  { %v49_v2 = vld [vmem:[#allocation5] sm:$0xff]  ;;  %v204_v3 = vpack.c.bf16 %v52_v1, %v50_v0  ;;  %v51_v4 = vld [vmem:[#allocation5 + $0x10] sm:$0xff]  ;;  %v54_v5 = vld [vmem:[#allocation5 + $0x28] sm:$0xff] }
  0x27   :  { %v56_v6 = vld [vmem:[#allocation5 + $0x38] sm:$0xff]  ;;  %v206_v7 = vpack.c.bf16 %v51_v4, %v49_v2  ;;  %v53_v9 = vld [vmem:[#allocation5 + $0x20] sm:$0xff]  ;;  %v55_v10 = vld [vmem:[#allocation5 + $0x30] sm:$0xff]  ;;  %v88_v57 = vshrl.u32 %v87_v56, 7 }
  0x28   :  { %v208_v8 = vpack.c.bf16 %v56_v6, %v54_v5  ;;  %v58_v11 = vld [vmem:[#allocation5 + $0x48] sm:$0xff]  ;;  %205 = vmatprep.subr.bf16.mxu0 %v204_v3  ;;  %v60_v12 = vld [vmem:[#allocation5 + $0x58] sm:$0xff]  ;;  %v210_v13 = vpack.c.bf16 %v55_v10, %v53_v9  ;;  %v57_v15 = vld [vmem:[#allocation5 + $0x40] sm:$0xff] }
  0x29   :  { %207 = vmatpush1.bf16.msra.mxu0 %v206_v7  ;;  %v212_v14 = vpack.c.bf16 %v60_v12, %v58_v11  ;;  %v59_v16 = vld [vmem:[#allocation5 + $0x50] sm:$0xff]  ;;  %v62_v17 = vld [vmem:[#allocation5 + $0x68] sm:$0xff]  ;;  %v64_v18 = vld [vmem:[#allocation5 + $0x78] sm:$0xff]  ;;  %v89_v58 = vsub.s32 0, %v88_v57  ;;  %v93_v60 = vsub.s32 1, %v88_v57  ;;  %v193_v12 = vstv %s375_s4 }
  0x2a   :  { %209 = vmatprep.subr.bf16.mxu0 %v208_v8  ;;  %v214_v19 = vpack.c.bf16 %v59_v16, %v57_v15  ;;  %v216_v20 = vpack.c.bf16 %v64_v18, %v62_v17  ;;  %v61_v21 = vld [vmem:[#allocation5 + $0x60] sm:$0xff]  ;;  %v63_v22 = vld [vmem:[#allocation5 + $0x70] sm:$0xff]  ;;  %v66_v23 = vld [vmem:[#allocation5 + $0x88] sm:$0xff] }
  0x2b   :  { %v68_v24 = vld [vmem:[#allocation5 + $0x98] sm:$0xff]  ;;  %v218_v25 = vpack.c.bf16 %v63_v22, %v61_v21  ;;  %v65_v28 = vld [vmem:[#allocation5 + $0x80] sm:$0xff]  ;;  %v67_v29 = vld [vmem:[#allocation5 + $0x90] sm:$0xff] }
  0x2c   :  { %v48_v26 = vld [vmem:[#allocation3 + $0x8] sm:$0xff]  ;;  %v220_v27 = vpack.c.bf16 %v68_v24, %v66_v23  ;;  %v70_v30 = vld [vmem:[#allocation5 + $0xa8] sm:$0xff]  ;;  %v222_v32 = vpack.c.bf16 %v67_v29, %v65_v28  ;;  %v69_v34 = vld [vmem:[#allocation5 + $0xa0] sm:$0xff] }
  0x2d   :  { %211 = vmatpush1.bf16.msra.mxu0 %v210_v13  ;;  %203 = vmatprep.mubr.msk.f32.mxu0 %vm97_vm0, %v48_v26  ;;  %v72_v31 = vld [vmem:[#allocation5 + $0xb8] sm:$0xff]  ;;  %v71_v35 = vld [vmem:[#allocation5 + $0xb0] sm:$0xff]  ;;  %v74_v36 = vld [vmem:[#allocation5 + $0xc8] sm:$0xff] }
  0x2e   :  { %213 = vmatprep.subr.bf16.mxu0 %v212_v14  ;;  %v224_v33 = vpack.c.bf16 %v72_v31, %v70_v30  ;;  %v76_v37 = vld [vmem:[#allocation5 + $0xd8] sm:$0xff]  ;;  %v226_v38 = vpack.c.bf16 %v71_v35, %v69_v34  ;;  %v73_v40 = vld [vmem:[#allocation5 + $0xc0] sm:$0xff]  ;;  %v75_v41 = vld [vmem:[#allocation5 + $0xd0] sm:$0xff] }
  0x2f   :  { %v228_v39 = vpack.c.bf16 %v76_v37, %v74_v36  ;;  %v78_v42 = vld [vmem:[#allocation5 + $0xe8] sm:$0xff]  ;;  %v80_v43 = vld [vmem:[#allocation5 + $0xf8] sm:$0xff]  ;;  %v230_v44 = vpack.c.bf16 %v75_v41, %v73_v40  ;;  %v77_v46 = vld [vmem:[#allocation5 + $0xe0] sm:$0xff] }
  0x30   :  { %v232_v45 = vpack.c.bf16 %v80_v43, %v78_v42  ;;  %v79_v47 = vld [vmem:[#allocation5 + $0xf0] sm:$0xff]  ;;  %v82_v48 = vld [vmem:[#allocation5 + $0x108] sm:$0xff]  ;;  %v84_v49 = vld [vmem:[#allocation5 + $0x118] sm:$0xff] }
  0x31   :  { %215 = vmatpush1.bf16.msra.mxu0 %v214_v19  ;;  %v234_v50 = vpack.c.bf16 %v79_v47, %v77_v46  ;;  %v236_v51 = vpack.c.bf16 %v84_v49, %v82_v48  ;;  %v81_v52 = vld [vmem:[#allocation5 + $0x100] sm:$0xff]  ;;  %v83_v53 = vld [vmem:[#allocation5 + $0x110] sm:$0xff] }
  0x32   :  { %217 = vmatprep.subr.bf16.mxu0 %v216_v20  ;;  %v238_v54 = vpack.c.bf16 %v83_v53, %v81_v52  ;;  %v47_v55 = vld [vmem:[#allocation3] sm:$0xff] }
  0x33   :  { %v85_v59 = vld [vmem:[%s373_s2] sm:$0x3] }
  0x34   :  { %v90_v61 = vrot.slane %v85_v59, %v89_v58  ;;  %v94_v62 = vrot.slane %v85_v59, %v93_v60  ;;  %v174_v63 = vld [vmem:[%s374_s3] sm:$0x3] }
  0x35   :  { %219 = vmatpush1.bf16.msra.mxu0 %v218_v25  ;;  %v183_v4 = vrot.slane %v174_v63, %v93_v60  ;;  %v179_v6 = vrot.slane %v174_v63, %v89_v58 }
  0x36   :  { %221 = vmatprep.subr.bf16.mxu0 %v220_v27 }
  0x39   :  { %223 = vmatpush1.bf16.msra.mxu0 %v222_v32 }
  0x3a   :  { %225 = vmatprep.subr.bf16.mxu0 %v224_v33 }
  0x3d   :  { %227 = vmatpush1.bf16.msra.mxu0 %v226_v38 }
  0x3e   :  { %229 = vmatprep.subr.bf16.mxu0 %v228_v39 }
  0x41   :  { %231 = vmatpush1.bf16.msra.mxu0 %v230_v44 }
  0x42   :  { %233 = vmatprep.subr.bf16.mxu0 %v232_v45 }
  0x45   :  { %235 = vmatpush1.bf16.msra.mxu0 %v234_v50 }
  0x46   :  { %237 = vmatprep.subr.bf16.mxu0 %v236_v51 }
  0x49   :  { %239 = vmatpush1.bf16.msra.mxu0 %v238_v54 }
  0x4c   :  { %166 = vmatmul.mubr.f32.vlgmr.msra.gmra.mrb[0].mxu0 %v47_v55 }
 0x11f   :  { %v167_v0 = vpop.f32.mrb[0].mxu0 }
 0x120   :  { %v168_v1 = vadd.f32 %v167_v0, %v90_v61  ;;  %v169_v2 = vpop.f32.mrb[1].mxu0 }
 0x121   :  { %v170_v3 = vadd.f32 %v169_v2, %v94_v62 }
 0x122   :  { %v172_v5 = vmax.f32 %v168_v1, 0.0 }
 0x123   :  { %v173_v7 = vmax.f32 %v170_v3, 0.0 }
 0x124   :  { %v186_v9 = vmul.f32 %v179_v6, %v172_v5 }
 0x125   :  { %v187_v8 = vmul.f32 %v183_v4, %v173_v7 }
 0x127   :  { %v188_v10 = vsel %vm97_vm0, %v187_v8, 0.0 }
 0x128   :  { %v189_v11 = vadd.f32 %v188_v10, %v186_v9 }
 0x12a   :  { %190 = vadd.xlane.f32.xlu0 %v189_v11 }
 0x1b7   :  { %v191_v13 = vpop.xlane.xlu0 %190 }
 0x1b8   :  { %v194_v14 = vadd.f32 %v193_v12, %v191_v13 }
 0x1ba   :  { %196 = vst.msk [vmem:[%s376_s5] sm:$0xff] %vm195_vm1, %v194_v14 }
 0x1bb   :  { %201 = vsyncpa [#allocation4], 1 }
 0x1bc   :  { %202 = vsyncpa [#allocation6], 1 }

</bundles_post_ra>
